<compile_context>
chip_gen: v7x
topology: tpu7x:2x2x1
jax: 0.10.0
libtpu: 0.0.40
codegen_flags: <defaults>
</compile_context>

<pallas_src>
import numpy as np

import jax
import jax.numpy as jnp
from jax.experimental import pallas as pl
from jax.experimental.pallas import tpu as pltpu

# ----------------------------------------------------------------------------
# Module constants (config.crop.crop_size = 16, config.pad.active = True,
# config.count = 2)
# ----------------------------------------------------------------------------
CROP_SIZE = 16
TARGET = CROP_SIZE // 2                      # pad-branch inner size = 8
PAD = (CROP_SIZE - TARGET) // 2              # 4 on every side (square)
COUNT = 2


# ----------------------------------------------------------------------------
# Host-side (trace-time) parameter setup: bilinear interpolation matrices.
# Matches F.interpolate(mode='bilinear', align_corners=False, antialias=False).
# ----------------------------------------------------------------------------
def _bilinear_matrix(out_size: int, in_size: int) -> np.ndarray:
    scale = in_size / out_size
    dst = np.arange(out_size, dtype=np.float64)
    src = np.clip((dst + 0.5) * scale - 0.5, 0.0, float(in_size - 1))
    lo = np.floor(src).astype(np.int64)
    hi = np.minimum(lo + 1, in_size - 1)
    w_hi = (src - lo).astype(np.float32)
    w_lo = (1.0 - w_hi).astype(np.float32)
    rows = np.arange(out_size)
    mat = np.zeros((out_size, in_size), np.float32)
    mat[rows, lo] += w_lo
    mat[rows, hi] += w_hi
    return mat


def _build_constants(h_in: int, w_in: int, channels: int, batch_tile: int):
    """One packed f32 buffer holding:
        rows [0, 16)               : zero-embedded height matrix (16, H_in)
                                     = Pad-rows( Resize8 @ Resize16 ) / 255
        rows [16, 16 + bt*W*C)     : block-diag (over batch-tile & channel)
                                     width matrix (bt*W*C, bt*C*16) with the
                                     Pad-cols zero-embedding folded in.
    """
    a_8_16 = _bilinear_matrix(TARGET, CROP_SIZE)                       # (8, 16)
    a_h8 = (a_8_16 @ _bilinear_matrix(CROP_SIZE, h_in)) / 255.0        # (8, H), ToTensor /255 folded
    a_w8 = a_8_16 @ _bilinear_matrix(CROP_SIZE, w_in)                  # (8, W)

    # Height matrix embedded into the 16 padded output rows.
    a_h = np.zeros((CROP_SIZE, h_in), np.float32)
    a_h[PAD:PAD + TARGET, :] = a_h8

    # Width matrix acting on the HWC-interleaved lane axis of one image,
    # producing the C*16 padded output cols (block-diagonal over channels):
    #   b_one[w*C + c, c*16 + PAD + k] = a_w8[k, w]
    wc = w_in * channels
    b_one = np.zeros((wc, channels * CROP_SIZE), np.float32)
    for c in range(channels):
        rows = np.arange(w_in) * channels + c
        b_one[rows, c * CROP_SIZE + PAD: c * CROP_SIZE + PAD + TARGET] = a_w8.T

    # Block-diagonal over the batch tile so one matmul handles bt images.
    b_pad = b_one if batch_tile == 1 else np.kron(
        np.eye(batch_tile, dtype=np.float32), b_one)

    width = max(h_in, b_pad.shape[1])
    packed = np.zeros((CROP_SIZE + b_pad.shape[0], width), np.float32)
    packed[:CROP_SIZE, :h_in] = a_h
    packed[CROP_SIZE:, :b_pad.shape[1]] = b_pad
    return jnp.asarray(packed)


# ----------------------------------------------------------------------------
# Fused kernel: ToTensor cast + composed (resize16 -> resize8 -> pad) as two
# matmuls + iota border fill, one lane-contiguous store per grid step.
# ----------------------------------------------------------------------------
def _pipeline_kernel(x_ref, c_ref, o_ref):
    # x_ref : (H, bt*W*C) uint8   -- raw HWC images, channels interleaved in lanes
    # c_ref : packed constants    -- see _build_constants
    # o_ref : (16, bt*C*16) f32
    h_in = x_ref.shape[0]
    wc_bt = x_ref.shape[1]
    out_cols = o_ref.shape[1]

    xf = x_ref[...].astype(jnp.float32)                               # ToTensor cast (scale in a_h)
    ah = c_ref[0:CROP_SIZE, 0:h_in]                                   # (16, H)
    bw = c_ref[CROP_SIZE:CROP_SIZE + wc_bt, 0:out_cols]               # (bt*W*C, bt*C*16)

    t = jnp.dot(ah, xf, preferred_element_type=jnp.float32)           # (16, bt*W*C)
    y = jnp.dot(t, bw, preferred_element_type=jnp.float32)            # (16, bt*C*16), 0 on borders

    # Pad(fill=1): border positions are exactly 0 after the zero-embedded
    # matmuls, so a single VPU add of the iota-built border mask finishes it.
    row = jax.lax.broadcasted_iota(jnp.int32, y.shape, 0)
    col = jax.lax.broadcasted_iota(jnp.int32, y.shape, 1) % CROP_SIZE
    border = ((row < PAD) | (row >= PAD + TARGET) |
              (col < PAD) | (col >= PAD + TARGET))
    o_ref[...] = y + border.astype(jnp.float32)                       # one store


# ----------------------------------------------------------------------------
# Wrappers
# ----------------------------------------------------------------------------
def _pick_batch_tile(b: int, w: int, c: int) -> int:
    """Smallest batch tile giving lane-dense (multiple-of-128) blocks; falls
    back to a single full-array block when none divides."""
    wc = w * c
    for bt in (8, 16, 32, 64, 128):
        if b % bt == 0 and (bt * wc) % 128 == 0 and (bt * c * CROP_SIZE) % 128 == 0:
            return bt
    return b


def pipeline_forward_batched(images_u8_bhwc, batch_tile=None):
    """images: (B, H, W, C) uint8 -> (B, C, 16, 16) float32."""
    b, h, w, c = images_u8_bhwc.shape
    bt = _pick_batch_tile(b, w, c) if batch_tile is None else batch_tile
    assert b % bt == 0
    wc = w * c
    out_cols_tile = bt * c * CROP_SIZE
    steps = b // bt

    consts = _build_constants(h, w, c, bt)
    # (B,H,W,C) -> (H, B*W*C): images side by side along lanes, per-image HWC
    # interleave preserved (tiny uint8 relayout done once by XLA).
    x_slab = jnp.transpose(images_u8_bhwc, (1, 0, 2, 3)).reshape(h, b * wc)

    flops = steps * (2 * CROP_SIZE * h * (bt * wc)
                     + 2 * CROP_SIZE * (bt * wc) * out_cols_tile)
    bytes_accessed = (x_slab.size                                   # uint8 in
                      + consts.size * 4                             # resident consts
                      + CROP_SIZE * b * c * CROP_SIZE * 4)          # f32 out

    y = pl.pallas_call(
        _pipeline_kernel,
        out_shape=jax.ShapeDtypeStruct((CROP_SIZE, b * c * CROP_SIZE), jnp.float32),
        grid=(steps,),
        in_specs=[
            pl.BlockSpec((h, bt * wc), lambda i: (0, i),
                         memory_space=pltpu.MemorySpace.VMEM),
            pl.BlockSpec(consts.shape, lambda i: (0, 0),
                         memory_space=pltpu.MemorySpace.VMEM),
        ],
        out_specs=pl.BlockSpec((CROP_SIZE, out_cols_tile), lambda i: (0, i),
                               memory_space=pltpu.MemorySpace.VMEM),
        compiler_params=pltpu.CompilerParams(
            dimension_semantics=("parallel",),          # 2 TCs on v7x, no-op elsewhere
            vmem_limit_bytes=32 * 1024 * 1024),
        cost_estimate=pl.CostEstimate(flops=flops, transcendentals=0,
                                      bytes_accessed=bytes_accessed),
    )(x_slab, consts)

    # (16, B*C*16) -> (B, C, 16, 16): tiny relayout done by XLA, keeps the
    # kernel store lane-contiguous.
    return y.reshape(CROP_SIZE, b, c, CROP_SIZE).transpose(1, 2, 0, 3)


def pipeline_forward(image_u8_hwc):
    """Single PIL-style (H, W, C) uint8 image -> list of COUNT (C, 16, 16) f32,
    mirroring Pipeline.forward (all stochastic transforms are Identity in this
    config, so the COUNT outputs are identical)."""
    y = pipeline_forward_batched(image_u8_hwc[None])[0]
    return [y for _ in range(COUNT)]


# ----------------------------------------------------------------------------
# Pure-numpy reference (same composed-matrix math) for validation.
# ----------------------------------------------------------------------------
def _reference_numpy(images_u8_bhwc):
    x = np.asarray(images_u8_bhwc).astype(np.float32)
    b, h, w, c = x.shape
    a_8_16 = _bilinear_matrix(TARGET, CROP_SIZE)
    a_h = (a_8_16 @ _bilinear_matrix(CROP_SIZE, h)) / 255.0
    a_w = a_8_16 @ _bilinear_matrix(CROP_SIZE, w)
    inner = np.einsum("kh,bhwc->bkwc", a_h, x)
    inner = np.einsum("lw,bkwc->bckl", a_w, inner)
    out = np.ones((b, c, CROP_SIZE, CROP_SIZE), np.float32)
    out[:, :, PAD:PAD + TARGET, PAD:PAD + TARGET] = inner
    return out


if __name__ == "__main__":
    # --- single image, exactly like the module's forward ---------------------
    key = jax.random.PRNGKey(0)
    image = jax.random.randint(key, (20, 24, 3), 0, 256, dtype=jnp.int32).astype(jnp.uint8)

    outs = pipeline_forward(image)
    for o in outs:
        jax.block_until_ready(o)

    assert len(outs) == COUNT
    assert outs[0].shape == (3, CROP_SIZE, CROP_SIZE)
    assert outs[0].dtype == jnp.float32
    ref1 = _reference_numpy(np.asarray(image)[None])[0]
    np.testing.assert_allclose(np.asarray(outs[0]), ref1, atol=1e-4, rtol=1e-4)
    # Pad(fill=1) border must be exactly 1.0; interior in [0, 1].
    assert np.allclose(np.asarray(outs[0])[:, :PAD, :], 1.0)
    inter = np.asarray(outs[0])[:, PAD:PAD + TARGET, PAD:PAD + TARGET]
    assert inter.min() >= 0.0 and inter.max() <= 1.0 + 1e-5

    # --- batched path (performance variant): lane-dense tiles, parallel grid --
    kb = jax.random.PRNGKey(1)
    images = jax.random.randint(kb, (32, 20, 24, 3), 0, 256,
                                dtype=jnp.int32).astype(jnp.uint8)
    out_b = pipeline_forward_batched(images)          # bt=16 -> grid=(2,)
    jax.block_until_ready(out_b)
    refb = _reference_numpy(np.asarray(images))
    np.testing.assert_allclose(np.asarray(out_b), refb, atol=1e-4, rtol=1e-4)

    print("KERNEL_OK")
</pallas_src>

<mosaic_0001>
module attributes {stable_mosaic.version = 11 : i64} {
  func.func @_pipeline_kernel(%arg0: i32, %arg1: memref<20x72xi8, #tpu.memory_space<vmem>>, %arg2: memref<88x48xf32, #tpu.memory_space<vmem>>, %arg3: memref<16x48xf32, #tpu.memory_space<vmem>>) attributes {dimension_semantics = [#tpu.dimension_semantics<parallel>], iteration_bounds = array<i64: 1>, scalar_prefetch = 0 : i64, scratch_operands = 0 : i64, tpu.core_type = #tpu.core_type<tc>, window_params = [{transform_indices = @transform_0, window_bounds = array<i64: 20, 72>}, {pipeline_mode = #tpu.pipeline_mode<synchronous>, transform_indices = @transform_1, window_bounds = array<i64: 88, 48>}, {transform_indices = @transform_2, window_bounds = array<i64: 16, 48>}]} {
    %c0 = arith.constant 0 : index
    %c0_0 = arith.constant 0 : index
    %0 = vector.load %arg1[%c0, %c0_0] : memref<20x72xi8, #tpu.memory_space<vmem>>, vector<20x72xi8>
    %1 = arith.uitofp %0 : vector<20x72xi8> to vector<20x72xf32>
    %c0_1 = arith.constant 0 : index
    %c0_2 = arith.constant 0 : index
    %2 = vector.load %arg2[%c0_1, %c0_2] : memref<88x48xf32, #tpu.memory_space<vmem>>, vector<16x20xf32>
    %c16 = arith.constant 16 : index
    %c0_3 = arith.constant 0 : index
    %3 = vector.load %arg2[%c16, %c0_3] : memref<88x48xf32, #tpu.memory_space<vmem>>, vector<72x48xf32>
    %cst = arith.constant dense<0.000000e+00> : vector<16x72xf32>
    %4 = tpu.matmul %2, %1, %cst {dimension_numbers = #tpu.dot_dimension_numbers<[1], [0], [0], [1], [0, 0, 1, 1], [], []>} : vector<16x20xf32>, vector<20x72xf32>, vector<16x72xf32> -> vector<16x72xf32>
    %cst_4 = arith.constant dense<0.000000e+00> : vector<16x48xf32>
    %5 = tpu.matmul %4, %3, %cst_4 {dimension_numbers = #tpu.dot_dimension_numbers<[1], [0], [0], [1], [0, 0, 1, 1], [], []>} : vector<16x72xf32>, vector<72x48xf32>, vector<16x48xf32> -> vector<16x48xf32>
    %6 = tpu.iota {dimensions = array<i32: 0>} : vector<16x48xi32>
    %7 = tpu.iota {dimensions = array<i32: 1>} : vector<16x48xi32>
    %c16_i32 = arith.constant 16 : i32
    %c0_i32 = arith.constant 0 : i32
    %8 = arith.cmpi eq, %c16_i32, %c0_i32 : i32
    %c1_i32 = arith.constant 1 : i32
    %9 = arith.select %8, %c1_i32, %c16_i32 : i32
    %10 = vector.broadcast %9 : i32 to vector<16x48xi32>
    %11 = arith.remsi %7, %10 : vector<16x48xi32>
    %c0_i32_5 = arith.constant 0 : i32
    %12 = vector.broadcast %c0_i32_5 : i32 to vector<16x48xi32>
    %13 = arith.cmpi ne, %11, %12 : vector<16x48xi32>
    %c0_i32_6 = arith.constant 0 : i32
    %14 = vector.broadcast %c0_i32_6 : i32 to vector<16x48xi32>
    %15 = arith.cmpi slt, %11, %14 : vector<16x48xi32>
    %c0_i32_7 = arith.constant 0 : i32
    %16 = arith.cmpi slt, %9, %c0_i32_7 : i32
    %17 = vector.broadcast %16 : i1 to vector<16x48xi1>
    %18 = vector.broadcast %17 : vector<16x48xi1> to vector<16x48xi1>
    %19 = arith.xori %15, %18 : vector<16x48xi1>
    %20 = arith.andi %19, %13 : vector<16x48xi1>
    %21 = vector.broadcast %9 : i32 to vector<16x48xi32>
    %22 = arith.addi %11, %21 : vector<16x48xi32>
    %23 = arith.select %20, %22, %11 : vector<16x48xi1>, vector<16x48xi32>
    %c4_i32 = arith.constant 4 : i32
    %24 = vector.broadcast %c4_i32 : i32 to vector<16x48xi32>
    %25 = arith.cmpi slt, %6, %24 : vector<16x48xi32>
    %c12_i32 = arith.constant 12 : i32
    %26 = vector.broadcast %c12_i32 : i32 to vector<16x48xi32>
    %27 = arith.cmpi sge, %6, %26 : vector<16x48xi32>
    %28 = arith.ori %25, %27 : vector<16x48xi1>
    %c4_i32_8 = arith.constant 4 : i32
    %29 = vector.broadcast %c4_i32_8 : i32 to vector<16x48xi32>
    %30 = arith.cmpi slt, %23, %29 : vector<16x48xi32>
    %31 = arith.ori %28, %30 : vector<16x48xi1>
    %c12_i32_9 = arith.constant 12 : i32
    %32 = vector.broadcast %c12_i32_9 : i32 to vector<16x48xi32>
    %33 = arith.cmpi sge, %23, %32 : vector<16x48xi32>
    %34 = arith.ori %31, %33 : vector<16x48xi1>
    %35 = arith.extui %34 : vector<16x48xi1> to vector<16x48xi32>
    %36 = arith.sitofp %35 : vector<16x48xi32> to vector<16x48xf32>
    %37 = arith.addf %5, %36 : vector<16x48xf32>
    %c0_10 = arith.constant 0 : index
    %c0_11 = arith.constant 0 : index
    %38 = vector.load %arg3[%c0_10, %c0_11] : memref<16x48xf32, #tpu.memory_space<vmem>>, vector<16x48xf32>
    tpu.vector_store %arg3[%c0_10, %c0_11], %37 {strides = array<i32>} : memref<16x48xf32, #tpu.memory_space<vmem>>, vector<16x48xf32>,
    return
  }
  func.func @transform_0(%arg0: i32) -> (i32, i32) {
    %c0_i32 = arith.constant 0 : i32
    %c0_i32_0 = arith.constant 0 : i32
    return %c0_i32, %arg0 : i32, i32
  }
  func.func @transform_1(%arg0: i32) -> (i32, i32) {
    %c0_i32 = arith.constant 0 : i32
    %c0_i32_0 = arith.constant 0 : i32
    %c0_i32_1 = arith.constant 0 : i32
    return %c0_i32, %c0_i32_0 : i32, i32
  }
  func.func @transform_2(%arg0: i32) -> (i32, i32) {
    %c0_i32 = arith.constant 0 : i32
    %c0_i32_0 = arith.constant 0 : i32
    return %c0_i32, %arg0 : i32, i32
  }
}

</mosaic_0001>

<bundles_post_ra>
// kernel: tpu_custom_call.1
= control target key start
LH: loop header
LB: loop body
LE: loop exit
PB: predicated region body
PF: predicated region fallthrough
CT: control target
= control target key end

     0   :  { %vm35_vm0 = vcmask 162816   ;;  %s432_s0 = inlined_call_operand.vmem [shape: u8[20,72], index: 0, kind: input, shape index: {}]   ;;  %s433_s1 = inlined_call_operand.vmem [shape: f32[88,48], index: 1, kind: input, shape index: {}]   ;;  %s434_s2 = inlined_call_operand.hbm [shape: f32[16,48], index: 2, kind: output, shape index: {}]  }
   0x1   :  { %v263_v0 = vld [vmem:[%s432_s0] sm:$0xf]   ;;  %v14_v1 = vld [vmem:[%s432_s0 + $0x4] sm:$0x1]  ;;  %v26_v6 = vld [vmem:[%s433_s1 + $0x10] sm:$0xff] }
   0x2   :  { %v24_v2 = vld [vmem:[%s433_s1] sm:$0xff]  ;;  %v264_v3 = vunpack.c.0.s8 %v263_v0  ;;  %v265_v4 = vunpack.c.1.s8 %v263_v0  ;;  %v17_v5 = vunpack.c.0.s8 %v14_v1  ;;  %v27_v7 = vld [vmem:[%s433_s1 + $0x18] sm:$0xff]  ;;  %v29_v10 = vld [vmem:[%s433_s1 + $0x28] sm:$0xff] }
   0x3   :  { %288 = vmatprep.mubr.msk.f32.mxu0 %vm35_vm0, %v24_v2  ;;  %v316_v8 = vpack.c.bf16 %v27_v7, %v26_v6  ;;  %v28_v9 = vld [vmem:[%s433_s1 + $0x20] sm:$0xff]  ;;  %v30_v15 = vld [vmem:[%s433_s1 + $0x30] sm:$0xff]  ;;  %v31_v16 = vld [vmem:[%s433_s1 + $0x38] sm:$0xff] }
   0x4   :  { %v18_v11 = vand.u32 255, %v264_v3  ;;  %v19_v12 = vand.u32 255, %v265_v4  ;;  %v20_v13 = vand.u32 255, %v17_v5  ;;  %v320_v14 = vpack.c.bf16 %v29_v10, %v28_v9 }
   0x5   :  { %317 = vmatprep.subr.bf16.mxu1 %v316_v8 }
   0x6   :  { %7 = vsyncpa [#allocation3], 0  ;;  %v21_v17 = vcvt.s32.f32 %v18_v11  ;;  %v22_v18 = vcvt.s32.f32 %v19_v12  ;;  %319 = vmatpush3.bf16.msra.mxu1 %v316_v8  ;;  %v324_v19 = vpack.c.bf16 %v31_v16, %v30_v15  ;;  %v23_v21 = vcvt.s32.f32 %v20_v13  ;;  %v32_v22 = vld [vmem:[%s433_s1 + $0x40] sm:$0xff]  ;;  %v33_v23 = vld [vmem:[%s433_s1 + $0x48] sm:$0xff] }
   0x7   :  { %321 = vmatprep.subr.bf16.mxu1 %v320_v14  ;;  %vm42_vm1 = vcmask 1043456   ;;  %v328_v24 = vpack.c.bf16 %v33_v23, %v32_v22  ;;  %v25_v25 = vld [vmem:[%s433_s1 + $0x8] sm:$0xff]  ;;  %v34_v26 = vld [vmem:[%s433_s1 + $0x50] sm:$0xff]  ;;  %vm154_vm2 = vcmask 588800   ;;  %v121_v29 = vlaneseq  ;;  %s361_s1 = smov [#allocation2]  }
   0x8   :  { %v312_v20 = vpack.c.bf16 %v22_v18, %v21_v17  ;;  %v360_v34 = vmov 0.0   ;;  %s244_s6 = sshll.u32 %s361_s1, 4  ;;  %vm236_vm11 = vcmask 392192   ;;  %s245_s6 = int_to_ptr.vmem [resolvable:$true] %s244_s6 }
   0x9   :  { %v122_v30 = vshrl.u32 %v121_v29, 7  ;;  %v125_v31 = vand.u32 127, %v121_v29  ;;  %s336_s7 = scalar_lea.vmem %s245_s6, 256  ;;  %p341_p1 = scmp.lt.s32.totalorder %s245_s6, %s245_s6 }
   0xa   :  { %313 = vmatprep.subr.bf16.mxu0 %v312_v20  ;;  %323 = vmatpush3.bf16.msra.mxu1 %v320_v14  ;;  %p337_p0 = scmp.ne.s32.totalorder %s245_s6, %s336_s7  ;;  %p342_p2 = scmp.lt.s32.totalorder %s336_s7, %s336_s7 }
   0xb   :  { %315 = vmatpush3.bf16.msra.mxu0 %v312_v20  ;;  %325 = vmatprep.subr.bf16.mxu1 %v324_v19  ;;  %v123_v32 = vadd.s32 8, %v122_v30  ;;  %v130_v33 = vand.u32 15, %v125_v31  ;;  %vm138_vm5 = vcmp.lt.s32.totalorder %v122_v30, 4 }
   0xc   :  { %286 = vmatprep.subr.msk.mxu0 %vm42_vm1, %v23_v21  ;;  %p343_p3 = por %p342_p2, %p341_p1 }
   0xd   :  { %vm141_vm3 = vcmp.ge.s32.totalorder %v123_v32, 12  ;;  %vm144_vm4 = vcmp.lt.s32.totalorder %v130_v33, 4  ;;  %vm147_vm7 = vcmp.ge.s32.totalorder %v130_v33, 12 }
   0xe   :  { %327 = vmatpush3.bf16.msra.mxu1 %v324_v19  ;;  %vm146_vm6 = vmor %vm141_vm3, %vm144_vm4  ;;  %p344_p4 = pnand %p343_p3, %p337_p0 }
   0xf   :  { %287 = vmatpush3.msk.msra.mxu0 %vm42_vm1, %v23_v21  ;;  %329 = vmatprep.subr.bf16.mxu1 %v328_v24  ;;  %vm145_vm8 = vmor %vm138_vm5, %vm144_vm4 }
  0x10   :  { %289 = vmatmul.mubr.msk.f32.vlgmr.msra.gmra.mrb[0].mxu0 %vm35_vm0, %v25_v25  ;;  %vm149_vm9 = vmor %vm146_vm6, %vm147_vm7 }
  0x11   :  { %vm148_vm10 = vmor %vm145_vm8, %vm147_vm7  ;;  %v259_v35 = vsel %vm149_vm9, 1.0, %v360_v34 }
  0x12   :  { %331 = vmatpush3.bf16.msra.mxu1 %v328_v24  ;;  %v258_v36 = vsel %vm148_vm10, 1.0, %v360_v34 }
  0x13   :  { %307 = vmatprep.subr.mxu1 %v34_v26 }
  0x16   :  { %308 = vmatpush3.msra.mxu1 %v34_v26 }
  0xe3   :  { %v290_v27 = vpop.f32.mrb[0].mxu0 }
  0xe4   :  { %v112_v28 = vpop.f32.mrb[1].mxu0 }
  0xe5   :  { %309 = vmatprep.mubr.msk.f32.mxu1 %vm154_vm2, %v112_v28 }
  0xe6   :  { %310 = vmatmul.mubr.msk.f32.vlgmr.msra.gmra.mrb[0].mxu1 %vm154_vm2, %v290_v27 }
 0x1b9   :  { %v311_v37 = vpop.f32.mrb[0].mxu1 }
 0x1ba   :  { %v233_v38 = vadd.f32 %v311_v37, %v259_v35  ;;  %v227_v39 = vpop.f32.mrb[1].mxu1 }
 0x1bb   :  { %v228_v40 = vadd.f32 %v258_v36, %v227_v39 }
 0x1bc   :  { %238 = vst.msk [vmem:[#allocation2 + $0x8] sm:$0xff] %vm236_vm11, %v233_v38 }
 0x1bd   :  { %237 = vst.msk [vmem:[#allocation2] sm:$0xff] %vm236_vm11, %v228_v40 }
 0x1be   :  { %347 = shalt.err (!%p344_p4)
}
 0x1bf   :  { %s348_s10 = scalar_lea.hbm %s434_s2, 256 }
 0x1c0   :  { %p349_p5 = scmp.ne.s32.totalorder %s434_s2, %s348_s10  ;;  %p352_p6 = scmp.lt.u32.totalorder %s348_s10, %s434_s2 }
 0x1c2   :  { %p354_p7 = pnand %p352_p6, %p349_p5 }
 0x1c4   :  { %357 = shalt.err (!%p354_p7)
}
 0x1c5   :  { %s362_s15 = smov 128   ;;  %s363_s16 = smov 8  }
 0x1c6   :  { %250 = dma.vmem_to_hbm [thread:$0]  %s245_s6, 256, %s434_s2, [#allocation3], %s362_s15, %s362_s15, %s363_s16  }
 0x1c7   :  { %358 = dma.done.wait [#allocation3], 256  }
 0x1c8   :  { %359 = vsyncadd [#allocation3], 4294967040 }
 0x1c9   :  { %254 = vsyncpa [#allocation3], 1 }

</bundles_post_ra>
